<compile_context>
chip_gen: v6e
topology: v6e:2x2x1
jax: 0.10.0
libtpu: 0.0.40
codegen_flags: <defaults>
</compile_context>

<pallas_src>
import functools

import jax
import jax.numpy as jnp
from jax.experimental import pallas as pl
from jax.experimental.pallas import tpu as pltpu

_LANES = 128      # vreg lane width
_SUBLANES = 8     # vreg sublane count (f32)


def _round_up(x, m):
    return (x + m - 1) // m * m


def _pad2(x, shape):
    """Zero-pad a 2-D array up to `shape`."""
    return jnp.pad(x, ((0, shape[0] - x.shape[0]), (0, shape[1] - x.shape[1])))


def _critic_kernel(state_dim,
                   x_ref,
                   wi_ref, bi_ref,
                   w1_ref, b1_ref,
                   w2_ref, b2_ref,
                   wf_ref, bf_ref,
                   out_ref):
    """Whole forward pass for one batch tile; weights are VMEM-resident."""
    x = x_ref[...]

    # Layer 1: state_dim -> H.  For tiny K the MXU pays full systolic
    # fill/drain for ~2 contraction rows, so do it on the VPU instead.
    if state_dim <= 8:
        wi = wi_ref[...]
        h = bi_ref[...] + x[:, 0:1] * wi[0:1, :]
        for k in range(1, state_dim):
            h = h + x[:, k:k + 1] * wi[k:k + 1, :]
    else:
        h = jnp.dot(x, wi_ref[...], preferred_element_type=jnp.float32) + bi_ref[...]
    h = jnp.maximum(h, 0.0)

    h = jnp.dot(h, w1_ref[...], preferred_element_type=jnp.float32) + b1_ref[...]
    h = jnp.maximum(h, 0.0)

    h = jnp.dot(h, w2_ref[...], preferred_element_type=jnp.float32) + b2_ref[...]
    h = jnp.maximum(h, 0.0)

    # Final layer padded to a full (H, 128) weight: only column 0 is
    # meaningful, but the lane-dense slab store avoids masked vst.msk.
    v = jnp.dot(h, wf_ref[...], preferred_element_type=jnp.float32) + bf_ref[...]
    out_ref[...] = v.astype(out_ref.dtype)


def critic_forward(state, params, *, tile_b=512):
    """state: (B, state_dim) float32. Returns value estimates (B, 1) float32."""
    wi, bi, w1, b1, w2, b2, wf, bf = params
    B, state_dim = state.shape
    hidden = wi.shape[1]
    H = _round_up(hidden, _LANES)          # lane-padded hidden / output width

    # Zero-pad hidden and output dims to a full 128-lane vreg width.
    # (Zero rows/cols contribute exactly 0; relu(0) = 0, so this is exact.)
    wi_p = _pad2(wi, (state_dim, H))
    bi_p = _pad2(bi, (1, H))
    w1_p = _pad2(w1, (H, H))
    b1_p = _pad2(b1, (1, H))
    w2_p = _pad2(w2, (H, H))
    b2_p = _pad2(b2, (1, H))
    wf_p = _pad2(wf, (H, H))               # only column 0 meaningful
    bf_p = _pad2(bf, (1, H))

    # Batch tiling: TILE_B rows per grid step (multiple of 8 sublanes).
    tb = min(tile_b, _round_up(B, _SUBLANES))
    Bp = _round_up(B, tb)
    x_p = _pad2(state.astype(jnp.float32), (Bp, state_dim))

    grid = (Bp // tb,)

    def resident(arr):
        # Weight/bias tiles: same block every step -> stays in VMEM.
        return pl.BlockSpec(arr.shape, lambda i: (0, 0))

    flops = 2 * Bp * H * (state_dim + 3 * H)
    bytes_accessed = 4 * (x_p.size + wi_p.size + bi_p.size + w1_p.size
                          + b1_p.size + w2_p.size + b2_p.size + wf_p.size
                          + bf_p.size + Bp * H)

    out = pl.pallas_call(
        functools.partial(_critic_kernel, state_dim),
        out_shape=jax.ShapeDtypeStruct((Bp, H), jnp.float32),
        grid=grid,
        in_specs=[
            pl.BlockSpec((tb, state_dim), lambda i: (i, 0)),   # streamed input
            resident(wi_p), resident(bi_p),
            resident(w1_p), resident(b1_p),
            resident(w2_p), resident(b2_p),
            resident(wf_p), resident(bf_p),
        ],
        out_specs=pl.BlockSpec((tb, H), lambda i: (i, 0)),     # lane-dense slab
        compiler_params=pltpu.CompilerParams(
            dimension_semantics=("parallel",),                 # megacore on v7x
            vmem_limit_bytes=32 << 20,                         # safe on v7x (64 MiB phys)
        ),
        cost_estimate=pl.CostEstimate(
            flops=flops, transcendentals=0, bytes_accessed=bytes_accessed),
    )(x_p, wi_p, bi_p, w1_p, b1_p, w2_p, b2_p, wf_p, bf_p)

    # Only column 0 of the slab is the critic value.
    return out[:B, :1]


def init_critic_params(key, state_dim, hidden_dim):
    """Deterministic init mimicking nn.Linear's U(-1/sqrt(fan_in), 1/sqrt(fan_in)).

    Weights are stored transposed relative to PyTorch: (in_features, out_features).
    Biases are stored as (1, out_features) rows for TPU-friendly broadcasting.
    """
    def linear(key, fan_in, fan_out):
        kw, kb = jax.random.split(key)
        bound = 1.0 / jnp.sqrt(jnp.float32(fan_in))
        w = jax.random.uniform(kw, (fan_in, fan_out), jnp.float32, -bound, bound)
        b = jax.random.uniform(kb, (1, fan_out), jnp.float32, -bound, bound)
        return w, b

    k0, k1, k2, k3 = jax.random.split(key, 4)
    wi, bi = linear(k0, state_dim, hidden_dim)
    w1, b1 = linear(k1, hidden_dim, hidden_dim)
    w2, b2 = linear(k2, hidden_dim, hidden_dim)
    wf, bf = linear(k3, hidden_dim, 1)
    return (wi, bi, w1, b1, w2, b2, wf, bf)


def critic_forward_ref(state, params):
    """Pure-JAX reference of the same forward pass."""
    wi, bi, w1, b1, w2, b2, wf, bf = params
    h = jnp.maximum(state @ wi + bi, 0.0)
    h = jnp.maximum(h @ w1 + b1, 0.0)
    h = jnp.maximum(h @ w2 + b2, 0.0)
    return h @ wf + bf


if __name__ == "__main__":
    key = jax.random.PRNGKey(0)
    kp, kx = jax.random.split(key)

    # Windy-gridworld-style sizes: small state_dim, modest hidden, small batch.
    batch, state_dim, hidden_dim = 8, 2, 32

    params = init_critic_params(kp, state_dim, hidden_dim)
    state = jax.random.normal(kx, (batch, state_dim), dtype=jnp.float32)

    value = jax.jit(critic_forward)(state, params)
    value = jax.block_until_ready(value)

    ref = critic_forward_ref(state, params)
    assert value.shape == (batch, 1)
    assert jnp.allclose(value, ref, atol=1e-4, rtol=1e-4), "mismatch vs reference"

    print("KERNEL_OK")
</pallas_src>

<mosaic_0001>
module attributes {stable_mosaic.version = 11 : i64} {
  func.func @_critic_kernel(%arg0: i32, %arg1: memref<8x2xf32, #tpu.memory_space<vmem>>, %arg2: memref<2x128xf32, #tpu.memory_space<vmem>>, %arg3: memref<1x128xf32, #tpu.memory_space<vmem>>, %arg4: memref<128x128xf32, #tpu.memory_space<vmem>>, %arg5: memref<1x128xf32, #tpu.memory_space<vmem>>, %arg6: memref<128x128xf32, #tpu.memory_space<vmem>>, %arg7: memref<1x128xf32, #tpu.memory_space<vmem>>, %arg8: memref<128x128xf32, #tpu.memory_space<vmem>>, %arg9: memref<1x128xf32, #tpu.memory_space<vmem>>, %arg10: memref<8x128xf32, #tpu.memory_space<vmem>>) attributes {dimension_semantics = [#tpu.dimension_semantics<parallel>], iteration_bounds = array<i64: 1>, scalar_prefetch = 0 : i64, scratch_operands = 0 : i64, tpu.core_type = #tpu.core_type<tc>, window_params = [{transform_indices = @transform_0, window_bounds = array<i64: 8, 2>}, {pipeline_mode = #tpu.pipeline_mode<synchronous>, transform_indices = @transform_1, window_bounds = array<i64: 2, 128>}, {pipeline_mode = #tpu.pipeline_mode<synchronous>, transform_indices = @transform_2, window_bounds = array<i64: 1, 128>}, {pipeline_mode = #tpu.pipeline_mode<synchronous>, transform_indices = @transform_3, window_bounds = array<i64: 128, 128>}, {pipeline_mode = #tpu.pipeline_mode<synchronous>, transform_indices = @transform_4, window_bounds = array<i64: 1, 128>}, {pipeline_mode = #tpu.pipeline_mode<synchronous>, transform_indices = @transform_5, window_bounds = array<i64: 128, 128>}, {pipeline_mode = #tpu.pipeline_mode<synchronous>, transform_indices = @transform_6, window_bounds = array<i64: 1, 128>}, {pipeline_mode = #tpu.pipeline_mode<synchronous>, transform_indices = @transform_7, window_bounds = array<i64: 128, 128>}, {pipeline_mode = #tpu.pipeline_mode<synchronous>, transform_indices = @transform_8, window_bounds = array<i64: 1, 128>}, {transform_indices = @transform_9, window_bounds = array<i64: 8, 128>}]} {
    %c0 = arith.constant 0 : index
    %c0_0 = arith.constant 0 : index
    %0 = vector.load %arg1[%c0, %c0_0] : memref<8x2xf32, #tpu.memory_space<vmem>>, vector<8x2xf32>
    %c0_1 = arith.constant 0 : index
    %c0_2 = arith.constant 0 : index
    %1 = vector.load %arg2[%c0_1, %c0_2] : memref<2x128xf32, #tpu.memory_space<vmem>>, vector<2x128xf32>
    %c0_3 = arith.constant 0 : index
    %c0_4 = arith.constant 0 : index
    %2 = vector.load %arg3[%c0_3, %c0_4] : memref<1x128xf32, #tpu.memory_space<vmem>>, vector<1x128xf32>
    %3 = vector.extract_strided_slice %0 {offsets = [0, 0], sizes = [8, 1], strides = [1, 1]} : vector<8x2xf32> to vector<8x1xf32>
    %4 = vector.extract_strided_slice %1 {offsets = [0, 0], sizes = [1, 128], strides = [1, 1]} : vector<2x128xf32> to vector<1x128xf32>
    %5 = vector.broadcast %3 : vector<8x1xf32> to vector<8x128xf32>
    %6 = vector.broadcast %4 : vector<1x128xf32> to vector<8x128xf32>
    %7 = arith.mulf %5, %6 : vector<8x128xf32>
    %8 = vector.broadcast %2 : vector<1x128xf32> to vector<8x128xf32>
    %9 = arith.addf %8, %7 : vector<8x128xf32>
    %10 = vector.extract_strided_slice %0 {offsets = [0, 1], sizes = [8, 1], strides = [1, 1]} : vector<8x2xf32> to vector<8x1xf32>
    %11 = vector.extract_strided_slice %1 {offsets = [1, 0], sizes = [1, 128], strides = [1, 1]} : vector<2x128xf32> to vector<1x128xf32>
    %12 = vector.broadcast %10 : vector<8x1xf32> to vector<8x128xf32>
    %13 = vector.broadcast %11 : vector<1x128xf32> to vector<8x128xf32>
    %14 = arith.mulf %12, %13 : vector<8x128xf32>
    %15 = arith.addf %9, %14 : vector<8x128xf32>
    %cst = arith.constant 0.000000e+00 : f32
    %16 = vector.broadcast %cst : f32 to vector<8x128xf32>
    %17 = arith.maximumf %15, %16 : vector<8x128xf32>
    %c0_5 = arith.constant 0 : index
    %c0_6 = arith.constant 0 : index
    %18 = vector.load %arg4[%c0_5, %c0_6] : memref<128x128xf32, #tpu.memory_space<vmem>>, vector<128x128xf32>
    %cst_7 = arith.constant dense<0.000000e+00> : vector<8x128xf32>
    %19 = tpu.matmul %17, %18, %cst_7 {dimension_numbers = #tpu.dot_dimension_numbers<[1], [0], [0], [1], [0, 0, 1, 1], [], []>} : vector<8x128xf32>, vector<128x128xf32>, vector<8x128xf32> -> vector<8x128xf32>
    %c0_8 = arith.constant 0 : index
    %c0_9 = arith.constant 0 : index
    %20 = vector.load %arg5[%c0_8, %c0_9] : memref<1x128xf32, #tpu.memory_space<vmem>>, vector<1x128xf32>
    %21 = vector.broadcast %20 : vector<1x128xf32> to vector<8x128xf32>
    %22 = arith.addf %19, %21 : vector<8x128xf32>
    %cst_10 = arith.constant 0.000000e+00 : f32
    %23 = vector.broadcast %cst_10 : f32 to vector<8x128xf32>
    %24 = arith.maximumf %22, %23 : vector<8x128xf32>
    %c0_11 = arith.constant 0 : index
    %c0_12 = arith.constant 0 : index
    %25 = vector.load %arg6[%c0_11, %c0_12] : memref<128x128xf32, #tpu.memory_space<vmem>>, vector<128x128xf32>
    %cst_13 = arith.constant dense<0.000000e+00> : vector<8x128xf32>
    %26 = tpu.matmul %24, %25, %cst_13 {dimension_numbers = #tpu.dot_dimension_numbers<[1], [0], [0], [1], [0, 0, 1, 1], [], []>} : vector<8x128xf32>, vector<128x128xf32>, vector<8x128xf32> -> vector<8x128xf32>
    %c0_14 = arith.constant 0 : index
    %c0_15 = arith.constant 0 : index
    %27 = vector.load %arg7[%c0_14, %c0_15] : memref<1x128xf32, #tpu.memory_space<vmem>>, vector<1x128xf32>
    %28 = vector.broadcast %27 : vector<1x128xf32> to vector<8x128xf32>
    %29 = arith.addf %26, %28 : vector<8x128xf32>
    %cst_16 = arith.constant 0.000000e+00 : f32
    %30 = vector.broadcast %cst_16 : f32 to vector<8x128xf32>
    %31 = arith.maximumf %29, %30 : vector<8x128xf32>
    %c0_17 = arith.constant 0 : index
    %c0_18 = arith.constant 0 : index
    %32 = vector.load %arg8[%c0_17, %c0_18] : memref<128x128xf32, #tpu.memory_space<vmem>>, vector<128x128xf32>
    %cst_19 = arith.constant dense<0.000000e+00> : vector<8x128xf32>
    %33 = tpu.matmul %31, %32, %cst_19 {dimension_numbers = #tpu.dot_dimension_numbers<[1], [0], [0], [1], [0, 0, 1, 1], [], []>} : vector<8x128xf32>, vector<128x128xf32>, vector<8x128xf32> -> vector<8x128xf32>
    %c0_20 = arith.constant 0 : index
    %c0_21 = arith.constant 0 : index
    %34 = vector.load %arg9[%c0_20, %c0_21] : memref<1x128xf32, #tpu.memory_space<vmem>>, vector<1x128xf32>
    %35 = vector.broadcast %34 : vector<1x128xf32> to vector<8x128xf32>
    %36 = arith.addf %33, %35 : vector<8x128xf32>
    %c0_22 = arith.constant 0 : index
    %c0_23 = arith.constant 0 : index
    %37 = vector.load %arg10[%c0_22, %c0_23] : memref<8x128xf32, #tpu.memory_space<vmem>>, vector<8x128xf32>
    tpu.vector_store %arg10[%c0_22, %c0_23], %36 {strides = array<i32>} : memref<8x128xf32, #tpu.memory_space<vmem>>, vector<8x128xf32>,
    return
  }
  func.func @transform_0(%arg0: i32) -> (i32, i32) {
    %c0_i32 = arith.constant 0 : i32
    %c0_i32_0 = arith.constant 0 : i32
    return %arg0, %c0_i32 : i32, i32
  }
  func.func @transform_1(%arg0: i32) -> (i32, i32) {
    %c0_i32 = arith.constant 0 : i32
    %c0_i32_0 = arith.constant 0 : i32
    %c0_i32_1 = arith.constant 0 : i32
    return %c0_i32, %c0_i32_0 : i32, i32
  }
  func.func @transform_2(%arg0: i32) -> (i32, i32) {
    %c0_i32 = arith.constant 0 : i32
    %c0_i32_0 = arith.constant 0 : i32
    %c0_i32_1 = arith.constant 0 : i32
    return %c0_i32, %c0_i32_0 : i32, i32
  }
  func.func @transform_3(%arg0: i32) -> (i32, i32) {
    %c0_i32 = arith.constant 0 : i32
    %c0_i32_0 = arith.constant 0 : i32
    %c0_i32_1 = arith.constant 0 : i32
    return %c0_i32, %c0_i32_0 : i32, i32
  }
  func.func @transform_4(%arg0: i32) -> (i32, i32) {
    %c0_i32 = arith.constant 0 : i32
    %c0_i32_0 = arith.constant 0 : i32
    %c0_i32_1 = arith.constant 0 : i32
    return %c0_i32, %c0_i32_0 : i32, i32
  }
  func.func @transform_5(%arg0: i32) -> (i32, i32) {
    %c0_i32 = arith.constant 0 : i32
    %c0_i32_0 = arith.constant 0 : i32
    %c0_i32_1 = arith.constant 0 : i32
    return %c0_i32, %c0_i32_0 : i32, i32
  }
  func.func @transform_6(%arg0: i32) -> (i32, i32) {
    %c0_i32 = arith.constant 0 : i32
    %c0_i32_0 = arith.constant 0 : i32
    %c0_i32_1 = arith.constant 0 : i32
    return %c0_i32, %c0_i32_0 : i32, i32
  }
  func.func @transform_7(%arg0: i32) -> (i32, i32) {
    %c0_i32 = arith.constant 0 : i32
    %c0_i32_0 = arith.constant 0 : i32
    %c0_i32_1 = arith.constant 0 : i32
    return %c0_i32, %c0_i32_0 : i32, i32
  }
  func.func @transform_8(%arg0: i32) -> (i32, i32) {
    %c0_i32 = arith.constant 0 : i32
    %c0_i32_0 = arith.constant 0 : i32
    %c0_i32_1 = arith.constant 0 : i32
    return %c0_i32, %c0_i32_0 : i32, i32
  }
  func.func @transform_9(%arg0: i32) -> (i32, i32) {
    %c0_i32 = arith.constant 0 : i32
    %c0_i32_0 = arith.constant 0 : i32
    return %arg0, %c0_i32 : i32, i32
  }
}

</mosaic_0001>

<bundles_post_ra>
// kernel: critic_forward.1
= control target key start
LH: loop header
LB: loop body
LE: loop exit
PB: predicated region body
PF: predicated region fallthrough
CT: control target
= control target key end

     0   :  { %v515_v0 = vmov 0   ;;  %v516_v2 = vmov 0.0   ;;  %v517_v7 = vmov 1   ;;  %vm518_vm0 = vmmov 0   ;;  %s788_s0 = inlined_call_operand.vmem [shape: f32[8,2], index: 0, kind: input, shape index: {}]   ;;  %s789_s3 = inlined_call_operand.vmem [shape: f32[128,128], index: 3, kind: input, shape index: {}]   ;;  %s790_s5 = inlined_call_operand.vmem [shape: f32[128,128], index: 5, kind: input, shape index: {}]   ;;  %s791_s1 = inlined_call_operand.vmem [shape: f32[2,128], index: 1, kind: input, shape index: {}]   ;;  %s792_s2 = inlined_call_operand.vmem [shape: f32[1,128], index: 2, kind: input, shape index: {}]   ;;  %s793_s7 = inlined_call_operand.vmem [shape: f32[128,128], index: 7, kind: input, shape index: {}]   ;;  %s794_s4 = inlined_call_operand.vmem [shape: f32[1,128], index: 4, kind: input, shape index: {}]   ;;  %s795_s6 = inlined_call_operand.vmem [shape: f32[1,128], index: 6, kind: input, shape index: {}]   ;;  %s796_s8 = inlined_call_operand.vmem [shape: f32[1,128], index: 8, kind: input, shape index: {}]   ;;  %s797_s9 = inlined_call_operand.vmem [shape: f32[8,128], index: 9, kind: output, shape index: {}]  }
   0x1   :  { %513 = vset.pattern.permute.xlu0 %v515_v0  ;;  %v32_v1 = vld [vmem:[%s788_s0] sm:$0xff]  ;;  %404 = vmatprep.subr.mxu0 %v516_v2  ;;  %v78_v3 = vld [vmem:[%s789_s3 + $0x78] sm:$0xff]  ;;  %v77_v4 = vld [vmem:[%s789_s3 + $0x70] sm:$0xff]  ;;  %v40_v33 = vlaneseq }
   0x2   :  { %37 = vperm.xlu0 %513, %v32_v1   ;;  %405 = vmatpush3.msra.mxu0 %v78_v3  ;;  %v76_v5 = vld [vmem:[%s789_s3 + $0x68] sm:$0xff]  ;;  %v75_v6 = vld [vmem:[%s789_s3 + $0x60] sm:$0xff]  ;;  %v74_v8 = vld [vmem:[%s789_s3 + $0x58] sm:$0xff] }
   0x3   :  { %406 = vmatprep.subr.mxu0 %v516_v2  ;;  %439 = vmatprep.subr.mxu1 %v516_v2  ;;  %v73_v9 = vld [vmem:[%s789_s3 + $0x50] sm:$0xff]  ;;  %v172_v10 = vld [vmem:[%s790_s5 + $0x78] sm:$0xff]  ;;  %v72_v12 = vld [vmem:[%s789_s3 + $0x48] sm:$0xff]  ;;  %v41_v34 = vshrl.u32 %v40_v33, 7 }
   0x4   :  { %407 = vmatpush3.msra.mxu0 %v77_v4  ;;  %436 = vmatprep.mubr.msk.f32.mxu0 %vm518_vm0, %v516_v2  ;;  %v171_v11 = vld [vmem:[%s790_s5 + $0x70] sm:$0xff]  ;;  %v170_v13 = vld [vmem:[%s790_s5 + $0x68] sm:$0xff]  ;;  %v71_v14 = vld [vmem:[%s789_s3 + $0x40] sm:$0xff] }
   0x5   :  { %408 = vmatprep.subr.mxu0 %v516_v2  ;;  %471 = vmatprep.mubr.msk.f32.mxu1 %vm518_vm0, %v516_v2  ;;  %v169_v15 = vld [vmem:[%s790_s5 + $0x60] sm:$0xff]  ;;  %v70_v16 = vld [vmem:[%s789_s3 + $0x38] sm:$0xff]  ;;  %v69_v18 = vld [vmem:[%s789_s3 + $0x30] sm:$0xff]  ;;  %v42_v35 = vsub.s32 0, %v41_v34  ;;  %v58_v38 = vsub.s32 1, %v41_v34 }
   0x6   :  { %514 = vset.pattern.permute.xlu0 %v517_v7  ;;  %409 = vmatpush3.msra.mxu0 %v76_v5  ;;  %v168_v17 = vld [vmem:[%s790_s5 + $0x58] sm:$0xff]  ;;  %v167_v19 = vld [vmem:[%s790_s5 + $0x50] sm:$0xff]  ;;  %v68_v20 = vld [vmem:[%s789_s3 + $0x28] sm:$0xff] }
   0x7   :  { %53 = vperm.xlu0 %514, %v32_v1   ;;  %410 = vmatprep.subr.mxu0 %v516_v2  ;;  %v166_v21 = vld [vmem:[%s790_s5 + $0x48] sm:$0xff]  ;;  %v67_v22 = vld [vmem:[%s789_s3 + $0x20] sm:$0xff]  ;;  %v66_v24 = vld [vmem:[%s789_s3 + $0x18] sm:$0xff] }
   0x8   :  { %411 = vmatpush3.msra.mxu0 %v75_v6  ;;  %440 = vmatpush3.msra.mxu1 %v172_v10  ;;  %v165_v23 = vld [vmem:[%s790_s5 + $0x40] sm:$0xff]  ;;  %v164_v25 = vld [vmem:[%s790_s5 + $0x38] sm:$0xff]  ;;  %v65_v26 = vld [vmem:[%s789_s3 + $0x10] sm:$0xff] }
   0x9   :  { %412 = vmatprep.subr.mxu0 %v516_v2  ;;  %441 = vmatprep.subr.mxu1 %v516_v2  ;;  %v163_v27 = vld [vmem:[%s790_s5 + $0x30] sm:$0xff]  ;;  %v64_v28 = vld [vmem:[%s789_s3 + $0x8] sm:$0xff]  ;;  %v63_v30 = vld [vmem:[%s789_s3] sm:$0xff] }
   0xa   :  { %413 = vmatpush3.msra.mxu0 %v74_v8  ;;  %442 = vmatpush3.msra.mxu1 %v171_v11  ;;  %v162_v29 = vld [vmem:[%s790_s5 + $0x28] sm:$0xff]  ;;  %v161_v31 = vld [vmem:[%s790_s5 + $0x20] sm:$0xff]  ;;  %v160_v32 = vld [vmem:[%s790_s5 + $0x18] sm:$0xff] }
   0xb   :  { %414 = vmatprep.subr.mxu0 %v516_v2  ;;  %443 = vmatprep.subr.mxu1 %v516_v2  ;;  %v33_v36 = vld [vmem:[%s791_s1] sm:$0x3]  ;;  %v159_v48 = vld [vmem:[%s790_s5 + $0x10] sm:$0xff]  ;;  %v158_v49 = vld [vmem:[%s790_s5 + $0x8] sm:$0xff] }
   0xc   :  { %415 = vmatpush3.msra.mxu0 %v73_v9  ;;  %444 = vmatpush3.msra.mxu1 %v170_v13  ;;  %v43_v37 = vrot.slane %v33_v36, %v42_v35  ;;  %v59_v41 = vrot.slane %v33_v36, %v58_v38  ;;  %v349_v42 = vld [vmem:[%s792_s2] ss:$0 sm:$0xff]  ;;  %v266_v51 = vld [vmem:[%s793_s7 + $0x78] sm:$0xff]  ;;  %v265_v52 = vld [vmem:[%s793_s7 + $0x70] sm:$0xff] }
   0xd   :  { %416 = vmatprep.subr.mxu0 %v516_v2  ;;  %445 = vmatprep.subr.mxu1 %v516_v2  ;;  %v157_v50 = vld [vmem:[%s790_s5] sm:$0xff]  ;;  %v264_v53 = vld [vmem:[%s793_s7 + $0x68] sm:$0xff]  ;;  %v262_v55 = vld [vmem:[%s793_s7 + $0x58] sm:$0xff] }
   0xe   :  { %417 = vmatpush3.msra.mxu0 %v72_v12  ;;  %446 = vmatpush3.msra.mxu1 %v169_v15  ;;  %v263_v54 = vld [vmem:[%s793_s7 + $0x60] sm:$0xff]  ;;  %v261_v56 = vld [vmem:[%s793_s7 + $0x50] sm:$0xff]  ;;  %v260_v57 = vld [vmem:[%s793_s7 + $0x48] sm:$0xff] }
   0xf   :  { %418 = vmatprep.subr.mxu0 %v516_v2  ;;  %447 = vmatprep.subr.mxu1 %v516_v2  ;;  %v259_v58 = vld [vmem:[%s793_s7 + $0x40] sm:$0xff]  ;;  %v258_v59 = vld [vmem:[%s793_s7 + $0x38] sm:$0xff]  ;;  %v257_v60 = vld [vmem:[%s793_s7 + $0x30] sm:$0xff] }
  0x10   :  { %419 = vmatpush3.msra.mxu0 %v71_v14  ;;  %448 = vmatpush3.msra.mxu1 %v168_v17  ;;  %v256_v61 = vld [vmem:[%s793_s7 + $0x28] sm:$0xff]  ;;  %v255_v62 = vld [vmem:[%s793_s7 + $0x20] sm:$0xff]  ;;  %v254_v63 = vld [vmem:[%s793_s7 + $0x18] sm:$0xff] }
  0x11   :  { %420 = vmatprep.subr.mxu0 %v516_v2  ;;  %449 = vmatprep.subr.mxu1 %v516_v2  ;;  %v350_v0 = vld [vmem:[%s794_s4] ss:$0 sm:$0xff]  ;;  %v253_v6 = vld [vmem:[%s793_s7 + $0x10] sm:$0xff]  ;;  %v252_v7 = vld [vmem:[%s793_s7 + $0x8] sm:$0xff] }
  0x12   :  { %421 = vmatpush3.msra.mxu0 %v70_v16  ;;  %450 = vmatpush3.msra.mxu1 %v167_v19  ;;  %v251_v8 = vld [vmem:[%s793_s7] sm:$0xff] }
  0x13   :  { %422 = vmatprep.subr.mxu0 %v516_v2  ;;  %451 = vmatprep.subr.mxu1 %v516_v2  ;;  %v351_v9 = vld [vmem:[%s795_s6] ss:$0 sm:$0xff] }
  0x14   :  { %423 = vmatpush3.msra.mxu0 %v69_v18  ;;  %452 = vmatpush3.msra.mxu1 %v166_v21  ;;  %v352_v14 = vld [vmem:[%s796_s8] ss:$0 sm:$0xff] }
  0x15   :  { %424 = vmatprep.subr.mxu0 %v516_v2  ;;  %453 = vmatprep.subr.mxu1 %v516_v2 }
  0x16   :  { %425 = vmatpush3.msra.mxu0 %v68_v20  ;;  %454 = vmatpush3.msra.mxu1 %v165_v23 }
  0x17   :  { %426 = vmatprep.subr.mxu0 %v516_v2  ;;  %455 = vmatprep.subr.mxu1 %v516_v2 }
  0x18   :  { %427 = vmatpush3.msra.mxu0 %v67_v22  ;;  %456 = vmatpush3.msra.mxu1 %v164_v25 }
  0x19   :  { %428 = vmatprep.subr.mxu0 %v516_v2  ;;  %457 = vmatprep.subr.mxu1 %v516_v2 }
  0x1a   :  { %429 = vmatpush3.msra.mxu0 %v66_v24  ;;  %458 = vmatpush3.msra.mxu1 %v163_v27 }
  0x1b   :  { %430 = vmatprep.subr.mxu0 %v516_v2  ;;  %459 = vmatprep.subr.mxu1 %v516_v2 }
  0x1c   :  { %431 = vmatpush3.msra.mxu0 %v65_v26  ;;  %460 = vmatpush3.msra.mxu1 %v162_v29 }
  0x1d   :  { %432 = vmatprep.subr.mxu0 %v516_v2  ;;  %461 = vmatprep.subr.mxu1 %v516_v2 }
  0x1e   :  { %433 = vmatpush3.msra.mxu0 %v64_v28  ;;  %462 = vmatpush3.msra.mxu1 %v161_v31 }
  0x1f   :  { %434 = vmatprep.subr.mxu0 %v516_v2  ;;  %463 = vmatprep.subr.mxu1 %v516_v2 }
  0x20   :  { %435 = vmatpush3.msra.mxu0 %v63_v30  ;;  %464 = vmatpush3.msra.mxu1 %v160_v32 }
  0x21   :  { %474 = vmatprep.subr.mxu0 %v516_v2  ;;  %465 = vmatprep.subr.mxu1 %v516_v2 }
  0x22   :  { %466 = vmatpush3.msra.mxu1 %v159_v48 }
  0x23   :  { %467 = vmatprep.subr.mxu1 %v516_v2 }
  0x24   :  { %468 = vmatpush3.msra.mxu1 %v158_v49 }
  0x25   :  { %469 = vmatprep.subr.mxu1 %v516_v2 }
  0x26   :  { %470 = vmatpush3.msra.mxu1 %v157_v50 }
  0x7d   :  { %v38_v39 = vpop.permute.xlu0 %37 }
  0x7e   :  { %v44_v40 = vmul.f32 %v43_v37, %v38_v39 }
  0x80   :  { %v51_v44 = vadd.f32 %v349_v42, %v44_v40 }
  0x82   :  { %v54_v43 = vpop.permute.xlu0 %53 }
  0x83   :  { %v60_v45 = vmul.f32 %v59_v41, %v54_v43 }
  0x85   :  { %v61_v46 = vadd.f32 %v60_v45, %v51_v44 }
  0x87   :  { %v62_v47 = vmax.f32 %v61_v46, 0.0 }
  0x89   :  { %437 = vmatmul.mubr.f32.vlgmr.msra.gmra.mxu0 %v62_v47 }
  0x8a   :  { %506 = vmatprep.mubr.msk.f32.mxu0 %vm518_vm0, %v516_v2  ;;  %475 = vmatpush3.msra.mxu0 %v266_v51 }
  0x8b   :  { %476 = vmatprep.subr.mxu0 %v516_v2 }
  0x8c   :  { %477 = vmatpush3.msra.mxu0 %v265_v52 }
  0x8d   :  { %478 = vmatprep.subr.mxu0 %v516_v2 }
  0x8e   :  { %479 = vmatpush3.msra.mxu0 %v264_v53 }
  0x8f   :  { %480 = vmatprep.subr.mxu0 %v516_v2 }
  0x90   :  { %481 = vmatpush3.msra.mxu0 %v263_v54 }
  0x91   :  { %482 = vmatprep.subr.mxu0 %v516_v2 }
  0x92   :  { %483 = vmatpush3.msra.mxu0 %v262_v55 }
  0x93   :  { %484 = vmatprep.subr.mxu0 %v516_v2 }
  0x94   :  { %485 = vmatpush3.msra.mxu0 %v261_v56 }
  0x95   :  { %486 = vmatprep.subr.mxu0 %v516_v2 }
  0x96   :  { %487 = vmatpush3.msra.mxu0 %v260_v57 }
  0x97   :  { %488 = vmatprep.subr.mxu0 %v516_v2 }
  0x98   :  { %489 = vmatpush3.msra.mxu0 %v259_v58 }
  0x99   :  { %490 = vmatprep.subr.mxu0 %v516_v2 }
  0x9a   :  { %491 = vmatpush3.msra.mxu0 %v258_v59 }
  0x9b   :  { %492 = vmatprep.subr.mxu0 %v516_v2 }
  0x9c   :  { %493 = vmatpush3.msra.mxu0 %v257_v60 }
  0x9d   :  { %494 = vmatprep.subr.mxu0 %v516_v2 }
  0x9e   :  { %495 = vmatpush3.msra.mxu0 %v256_v61 }
  0x9f   :  { %496 = vmatprep.subr.mxu0 %v516_v2 }
  0xa0   :  { %497 = vmatpush3.msra.mxu0 %v255_v62 }
  0xa1   :  { %498 = vmatprep.subr.mxu0 %v516_v2 }
  0xa2   :  { %499 = vmatpush3.msra.mxu0 %v254_v63 }
  0xa3   :  { %500 = vmatprep.subr.mxu0 %v516_v2 }
  0xa4   :  { %501 = vmatpush3.msra.mxu0 %v253_v6 }
  0xa5   :  { %502 = vmatprep.subr.mxu0 %v516_v2 }
  0xa6   :  { %503 = vmatpush3.msra.mxu0 %v252_v7 }
  0xa7   :  { %504 = vmatprep.subr.mxu0 %v516_v2 }
  0xa8   :  { %505 = vmatpush3.msra.mxu0 %v251_v8 }
 0x149   :  { %v152_v1 = vpop.f32.mrf.mxu0 }
 0x14a   :  { %v153_v3 = vadd.f32 %v350_v0, %v152_v1 }
 0x14b   :  { %v438_v4 = vpop.f32.mrf.mxu0 }
 0x14c   :  { %v156_v5 = vmax.f32 %v153_v3, 0.0 }
 0x14e   :  { %472 = vmatmul.mubr.f32.vlgmr.msra.gmra.mxu1 %v156_v5 }
 0x20e   :  { %v246_v10 = vpop.f32.mrf.mxu1 }
 0x20f   :  { %v247_v11 = vadd.f32 %v351_v9, %v246_v10 }
 0x210   :  { %v473_v12 = vpop.f32.mrf.mxu1 }
 0x211   :  { %v250_v13 = vmax.f32 %v247_v11, 0.0 }
 0x213   :  { %507 = vmatmul.mubr.f32.vlgmr.msra.gmra.mxu0 %v250_v13 }
 0x2d3   :  { %v340_v15 = vpop.f32.mrf.mxu0 }
 0x2d4   :  { %v341_v2 = vadd.f32 %v352_v14, %v340_v15 }
 0x2d5   :  { %v508_v16 = vpop.f32.mrf.mxu0 }
 0x2d6   :  { %344 = vst [vmem:[%s797_s9] sm:$0xff] %v341_v2 }

</bundles_post_ra>
